<compile_context>
chip_gen: v6e
topology: v6e:2x2x1
jax: 0.10.0
libtpu: 0.0.40
codegen_flags: <defaults>
</compile_context>

<pallas_src>
import jax
import jax.numpy as jnp
from jax.experimental import pallas as pl
from jax.experimental.pallas import tpu as pltpu

ALPHA = 0.75
# GAMMA = 2.0 is applied as an explicit square below.

LOSS_NAMES = ("total_class", "object_class", "center", "size", "angle")


def _focal_sum(x, t):
    """sum(focal_loss(x, t, reduction='none')) using the module's exact formula."""
    # F.binary_cross_entropy_with_logits, reduction='none'
    ce = jnp.maximum(x, 0.0) - x * t + jnp.log1p(jnp.exp(-jnp.abs(x)))
    # NOTE: the reference module uses raw logits here (not sigmoid) - reproduced exactly.
    p_t = x * t + (1.0 - x) * (1.0 - t)
    one_minus = 1.0 - p_t                      # gamma == 2.0 -> explicit square
    alpha_t = ALPHA * t + (1.0 - ALPHA) * (1.0 - t)
    return jnp.sum(alpha_t * ce * (one_minus * one_minus))


def _make_kernel(Cc, Cp, Cs, Ca):
    """Builds the fused SetCriterion kernel for the given per-head channel splits."""

    def kernel(i_ref, j_ref, pred_ref, gt_ref, out_ref):
        # i_ref, j_ref : (B, M, 1) int32, VMEM    (matcher indices)
        # pred_ref     : (B, N, Ctot)  packed class|center|size|angle predictions
        # gt_ref       : (B, M, Ctot)  packed ground truth
        # out_ref      : (5,) f32, SMEM
        f32 = jnp.float32
        B, N, _ = pred_ref.shape
        M = gt_ref.shape[1]
        m_total = B * M                         # == j.numel() in the PyTorch module

        pred = pred_ref[...].astype(f32)        # (B, N, Ctot)
        gt = gt_ref[...].astype(f32)            # (B, M, Ctot)

        # One-hot selection matrices built from iota vs. the index tables.
        n_iota = jax.lax.broadcasted_iota(jnp.int32, (B, M, N), 2)
        s_i = (n_iota == i_ref[...]).astype(f32)          # (B, M, N)
        m_iota = jax.lax.broadcasted_iota(jnp.int32, (B, M, M), 2)
        s_j = (m_iota == j_ref[...]).astype(f32)          # (B, M, M)

        # Gathers on the MXU: prediction rows by i, ground-truth rows by j (lane-dense).
        g_pred = jnp.einsum("bmn,bnc->bmc", s_i, pred,
                            preferred_element_type=f32)   # (B, M, Ctot)
        g_gt = jnp.einsum("bmk,bkc->bmc", s_j, gt,
                          preferred_element_type=f32)     # (B, M, Ctot)

        # total_class target: scatter_ of gt_class rows into a background one-hot.
        # Matcher indices are unique per batch, so the matmul-sum == last-write-wins.
        gt_cls = gt[:, :, :Cc]                             # (B, M, Cc)
        scattered = jnp.einsum("bmn,bmc->bnc", s_i, gt_cls,
                               preferred_element_type=f32)  # (B, N, Cc)
        coverage = jnp.sum(s_i, axis=1)                    # (B, N), 1 where scattered
        lane0 = (jax.lax.broadcasted_iota(jnp.int32, (B, N, Cc), 2) == 0).astype(f32)
        toh = scattered + (1.0 - coverage)[:, :, None] * lane0

        # total_class: focal(all preds, scattered one-hot).mean(1).sum() / M_total * N
        out_ref[0] = _focal_sum(pred[:, :, :Cc], toh) / f32(m_total)

        # object_class: focal(gathered).mean(1).sum() / M_total * N
        out_ref[1] = _focal_sum(g_pred[:, :, :Cc], g_gt[:, :, :Cc]) * (
            f32(N) / (f32(M) * f32(m_total)))

        # L1 losses: one |diff| pass over packed regression lanes, three lane-sliced sums.
        reg_diff = jnp.abs(g_pred[:, :, Cc:] - g_gt[:, :, Cc:])   # (B, M, Cp+Cs+Ca)
        out_ref[2] = jnp.sum(reg_diff[:, :, :Cp]) / f32(B * M * Cp)
        out_ref[3] = jnp.sum(reg_diff[:, :, Cp:Cp + Cs]) / f32(B * M * Cs)
        out_ref[4] = jnp.sum(reg_diff[:, :, Cp + Cs:]) / f32(B * M * Ca)

    return kernel


def set_criterion_forward(inputs, targets, indices):
    """Fused SetCriterion.forward: one Pallas kernel, five scalar losses."""
    i, j = indices
    B, M = i.shape
    i = i.astype(jnp.int32).reshape(B, M, 1)
    j = j.astype(jnp.int32).reshape(B, M, 1)

    # Pack heads along the lane dimension: class | center | size | angle.
    pred = jnp.concatenate(
        [inputs["class"], inputs["center"], inputs["size"], inputs["angle"]], axis=-1)
    gt = jnp.concatenate(
        [targets["gt_class"], targets["gt_center"], targets["gt_size"],
         targets["gt_angle"]], axis=-1)

    _, N, Cc = inputs["class"].shape
    Cp = inputs["center"].shape[2]
    Cs = inputs["size"].shape[2]
    Ca = inputs["angle"].shape[2]
    Ctot = Cc + Cp + Cs + Ca
    Cr = Cp + Cs + Ca

    arrays = (i, j, pred, gt)
    bytes_accessed = sum(int(a.size) * a.dtype.itemsize for a in arrays) + 5 * 4
    cost = pl.CostEstimate(
        flops=int(2 * B * M * N * Ctot          # gather preds (MXU)
                  + 2 * B * M * M * Ctot        # gather gts   (MXU)
                  + 2 * B * M * N * Cc          # scatter one-hot (MXU)
                  + 15 * B * (N + M) * Cc       # focal elementwise
                  + 4 * B * M * Cr),            # L1
        transcendentals=int(2 * B * (N + M) * Cc),
        bytes_accessed=int(bytes_accessed),
    )

    vmem = pl.BlockSpec(memory_space=pltpu.MemorySpace.VMEM)
    out = pl.pallas_call(
        _make_kernel(Cc, Cp, Cs, Ca),
        out_shape=jax.ShapeDtypeStruct((5,), jnp.float32),
        in_specs=[vmem, vmem, vmem, vmem],
        out_specs=pl.BlockSpec(memory_space=pltpu.MemorySpace.SMEM),
        cost_estimate=cost,
    )(*arrays)
    return {name: out[k] for k, name in enumerate(LOSS_NAMES)}


# ---------------------------------------------------------------------------
# Pure-JAX reference (numerical sanity check of the kernel)
# ---------------------------------------------------------------------------
def _batched_index_select(batch, inds):
    return jnp.take_along_axis(batch, inds[:, :, None].astype(jnp.int32), axis=1)


def _focal_ref(x, t):
    ce = jnp.maximum(x, 0.0) - x * t + jnp.log1p(jnp.exp(-jnp.abs(x)))
    p_t = x * t + (1.0 - x) * (1.0 - t)
    loss = ce * (1.0 - p_t) ** 2
    return (ALPHA * t + (1.0 - ALPHA) * (1.0 - t)) * loss


def _reference(inputs, targets, indices):
    i, j = indices
    out = {}
    x = inputs["class"]
    B, N, C = x.shape
    M = j.size
    one_hot = jnp.zeros((B, N, C), x.dtype).at[:, :, 0].set(1.0)
    b_idx = jnp.arange(B)[:, None]
    toh = one_hot.at[b_idx, i, :].set(targets["gt_class"])
    out["total_class"] = _focal_ref(x, toh).mean(1).sum() / M * N
    gi = _batched_index_select(x, i)
    gt = _batched_index_select(targets["gt_class"], j)
    out["object_class"] = _focal_ref(gi, gt).mean(1).sum() / M * N
    for k in ("center", "size", "angle"):
        a = _batched_index_select(inputs[k], i)
        b = _batched_index_select(targets[f"gt_{k}"], j)
        out[k] = jnp.mean(jnp.abs(a - b))
    return out


# ---------------------------------------------------------------------------
if __name__ == "__main__":
    B, N, M = 2, 8, 4
    C_CLASS, C_CENTER, C_SIZE, C_ANGLE = 4, 3, 3, 1

    key = jax.random.PRNGKey(0)
    keys = jax.random.split(key, 12)

    inputs = {
        "class": jax.random.normal(keys[0], (B, N, C_CLASS), jnp.float32),
        "center": jax.random.normal(keys[1], (B, N, C_CENTER), jnp.float32),
        "size": jax.random.normal(keys[2], (B, N, C_SIZE), jnp.float32),
        "angle": jax.random.normal(keys[3], (B, N, C_ANGLE), jnp.float32),
    }
    gt_cls_idx = jax.random.randint(keys[4], (B, M), 1, C_CLASS)
    targets = {
        "gt_class": jax.nn.one_hot(gt_cls_idx, C_CLASS, dtype=jnp.float32),
        "gt_center": jax.random.normal(keys[5], (B, M, C_CENTER), jnp.float32),
        "gt_size": jax.random.normal(keys[6], (B, M, C_SIZE), jnp.float32),
        "gt_angle": jax.random.normal(keys[7], (B, M, C_ANGLE), jnp.float32),
    }
    # association indices: unique prediction indices per batch (as a matcher would give)
    i = jnp.stack(
        [jax.random.permutation(keys[8 + b], N)[:M] for b in range(B)]
    ).astype(jnp.int32)
    j = jnp.stack(
        [jax.random.permutation(keys[10 + b], M) for b in range(B)]
    ).astype(jnp.int32)
    indices = (i, j)

    losses = set_criterion_forward(inputs, targets, indices)
    losses = {k: jax.block_until_ready(v) for k, v in losses.items()}

    ref = _reference(inputs, targets, indices)
    for k in losses:
        assert jnp.allclose(losses[k], ref[k], rtol=1e-5, atol=1e-5), (
            k,
            losses[k],
            ref[k],
        )

    print("KERNEL_OK")
</pallas_src>

<mosaic_0001>
module attributes {stable_mosaic.version = 11 : i64} {
  func.func @kernel(%arg0: memref<2x4x1xi32, #tpu.memory_space<vmem>>, %arg1: memref<2x4x1xi32, #tpu.memory_space<vmem>>, %arg2: memref<2x8x11xf32, #tpu.memory_space<vmem>>, %arg3: memref<2x4x11xf32, #tpu.memory_space<vmem>>, %arg4: memref<5xf32, #tpu.memory_space<smem>>) attributes {dimension_semantics = [], scalar_prefetch = 0 : i64, scratch_operands = 0 : i64, tpu.core_type = #tpu.core_type<tc>} {
    %c0 = arith.constant 0 : index
    %c0_0 = arith.constant 0 : index
    %c0_1 = arith.constant 0 : index
    %0 = vector.load %arg2[%c0, %c0_0, %c0_1] : memref<2x8x11xf32, #tpu.memory_space<vmem>>, vector<2x8x11xf32>
    %c0_2 = arith.constant 0 : index
    %c0_3 = arith.constant 0 : index
    %c0_4 = arith.constant 0 : index
    %1 = vector.load %arg3[%c0_2, %c0_3, %c0_4] : memref<2x4x11xf32, #tpu.memory_space<vmem>>, vector<2x4x11xf32>
    %2 = tpu.iota {dimensions = array<i32: 2>} : vector<2x4x8xi32>
    %c0_5 = arith.constant 0 : index
    %c0_6 = arith.constant 0 : index
    %c0_7 = arith.constant 0 : index
    %3 = vector.load %arg0[%c0_5, %c0_6, %c0_7] : memref<2x4x1xi32, #tpu.memory_space<vmem>>, vector<2x4x1xi32>
    %4 = vector.broadcast %3 : vector<2x4x1xi32> to vector<2x4x8xi32>
    %5 = arith.cmpi eq, %2, %4 : vector<2x4x8xi32>
    %6 = arith.extui %5 : vector<2x4x8xi1> to vector<2x4x8xi32>
    %7 = arith.sitofp %6 : vector<2x4x8xi32> to vector<2x4x8xf32>
    %8 = tpu.iota {dimensions = array<i32: 2>} : vector<2x4x4xi32>
    %c0_8 = arith.constant 0 : index
    %c0_9 = arith.constant 0 : index
    %c0_10 = arith.constant 0 : index
    %9 = vector.load %arg1[%c0_8, %c0_9, %c0_10] : memref<2x4x1xi32, #tpu.memory_space<vmem>>, vector<2x4x1xi32>
    %10 = vector.broadcast %9 : vector<2x4x1xi32> to vector<2x4x4xi32>
    %11 = arith.cmpi eq, %8, %10 : vector<2x4x4xi32>
    %12 = arith.extui %11 : vector<2x4x4xi1> to vector<2x4x4xi32>
    %13 = arith.sitofp %12 : vector<2x4x4xi32> to vector<2x4x4xf32>
    "tpu.trace_start"() <{level = 10 : i32, message = "bmn,bnc->bmc"}> : () -> ()
    %cst = arith.constant dense<0.000000e+00> : vector<2x4x11xf32>
    %14 = tpu.matmul %7, %0, %cst {dimension_numbers = #tpu.dot_dimension_numbers<[2], [1], [1], [2], [0, 0, 0, 1, 1, 2], [0], [0]>} : vector<2x4x8xf32>, vector<2x8x11xf32>, vector<2x4x11xf32> -> vector<2x4x11xf32>
    "tpu.trace_stop"() : () -> ()
    "tpu.trace_start"() <{level = 10 : i32, message = "bmk,bkc->bmc"}> : () -> ()
    %cst_11 = arith.constant dense<0.000000e+00> : vector<2x4x11xf32>
    %15 = tpu.matmul %13, %1, %cst_11 {dimension_numbers = #tpu.dot_dimension_numbers<[2], [1], [1], [2], [0, 0, 0, 1, 1, 2], [0], [0]>} : vector<2x4x4xf32>, vector<2x4x11xf32>, vector<2x4x11xf32> -> vector<2x4x11xf32>
    "tpu.trace_stop"() : () -> ()
    %16 = vector.extract_strided_slice %1 {offsets = [0, 0, 0], sizes = [2, 4, 4], strides = [1, 1, 1]} : vector<2x4x11xf32> to vector<2x4x4xf32>
    "tpu.trace_start"() <{level = 10 : i32, message = "bmn,bmc->bnc"}> : () -> ()
    %cst_12 = arith.constant dense<0.000000e+00> : vector<2x8x4xf32>
    %17 = tpu.matmul %7, %16, %cst_12 {dimension_numbers = #tpu.dot_dimension_numbers<[1], [1], [2], [2], [0, 0, 0, 2, 1, 2], [0], [0]>} : vector<2x4x8xf32>, vector<2x4x4xf32>, vector<2x8x4xf32> -> vector<2x8x4xf32>
    "tpu.trace_stop"() : () -> ()
    %cst_13 = arith.constant dense<0.000000e+00> : vector<2x8xf32>
    %18 = vector.multi_reduction <add>, %7, %cst_13 [1] : vector<2x4x8xf32> to vector<2x8xf32>
    %19 = tpu.iota {dimensions = array<i32: 2>} : vector<2x8x4xi32>
    %c0_i32 = arith.constant 0 : i32
    %20 = vector.broadcast %c0_i32 : i32 to vector<2x8x4xi32>
    %21 = arith.cmpi eq, %19, %20 : vector<2x8x4xi32>
    %22 = arith.extui %21 : vector<2x8x4xi1> to vector<2x8x4xi32>
    %23 = arith.sitofp %22 : vector<2x8x4xi32> to vector<2x8x4xf32>
    %cst_14 = arith.constant 1.000000e+00 : f32
    %24 = vector.broadcast %cst_14 : f32 to vector<2x8xf32>
    %25 = arith.subf %24, %18 : vector<2x8xf32>
    %26 = vector.shape_cast %25 : vector<2x8xf32> to vector<2x8x1xf32>
    %27 = vector.broadcast %26 : vector<2x8x1xf32> to vector<2x8x4xf32>
    %28 = arith.mulf %27, %23 : vector<2x8x4xf32>
    %29 = arith.addf %17, %28 : vector<2x8x4xf32>
    %30 = vector.extract_strided_slice %0 {offsets = [0, 0, 0], sizes = [2, 8, 4], strides = [1, 1, 1]} : vector<2x8x11xf32> to vector<2x8x4xf32>
    %cst_15 = arith.constant 0.000000e+00 : f32
    %31 = vector.broadcast %cst_15 : f32 to vector<2x8x4xf32>
    %32 = arith.maximumf %30, %31 : vector<2x8x4xf32>
    %33 = arith.mulf %30, %29 : vector<2x8x4xf32>
    %34 = arith.subf %32, %33 : vector<2x8x4xf32>
    %35 = math.absf %30 : vector<2x8x4xf32>
    %cst_16 = arith.constant 0.000000e+00 : f32
    %36 = vector.broadcast %cst_16 : f32 to vector<2x8x4xf32>
    %37 = arith.subf %36, %35 : vector<2x8x4xf32>
    %38 = math.exp %37 : vector<2x8x4xf32>
    %39 = math.log1p %38 : vector<2x8x4xf32>
    %40 = arith.addf %34, %39 : vector<2x8x4xf32>
    %41 = arith.mulf %30, %29 : vector<2x8x4xf32>
    %cst_17 = arith.constant 1.000000e+00 : f32
    %42 = vector.broadcast %cst_17 : f32 to vector<2x8x4xf32>
    %43 = arith.subf %42, %30 : vector<2x8x4xf32>
    %cst_18 = arith.constant 1.000000e+00 : f32
    %44 = vector.broadcast %cst_18 : f32 to vector<2x8x4xf32>
    %45 = arith.subf %44, %29 : vector<2x8x4xf32>
    %46 = arith.mulf %43, %45 : vector<2x8x4xf32>
    %47 = arith.addf %41, %46 : vector<2x8x4xf32>
    %cst_19 = arith.constant 1.000000e+00 : f32
    %48 = vector.broadcast %cst_19 : f32 to vector<2x8x4xf32>
    %49 = arith.subf %48, %47 : vector<2x8x4xf32>
    %cst_20 = arith.constant 7.500000e-01 : f32
    %50 = vector.broadcast %cst_20 : f32 to vector<2x8x4xf32>
    %51 = arith.mulf %50, %29 : vector<2x8x4xf32>
    %cst_21 = arith.constant 1.000000e+00 : f32
    %52 = vector.broadcast %cst_21 : f32 to vector<2x8x4xf32>
    %53 = arith.subf %52, %29 : vector<2x8x4xf32>
    %cst_22 = arith.constant 2.500000e-01 : f32
    %54 = vector.broadcast %cst_22 : f32 to vector<2x8x4xf32>
    %55 = arith.mulf %54, %53 : vector<2x8x4xf32>
    %56 = arith.addf %51, %55 : vector<2x8x4xf32>
    %57 = arith.mulf %56, %40 : vector<2x8x4xf32>
    %58 = arith.mulf %49, %49 : vector<2x8x4xf32>
    %59 = arith.mulf %57, %58 : vector<2x8x4xf32>
    %60 = vector.shape_cast %59 : vector<2x8x4xf32> to vector<1x2x8x4xf32>
    %cst_23 = arith.constant dense<0.000000e+00> : vector<1xf32>
    %61 = vector.multi_reduction <add>, %60, %cst_23 [1, 2, 3] : vector<1x2x8x4xf32> to vector<1xf32>
    %62 = vector.shape_cast %61 : vector<1xf32> to vector<1x1x1x1xf32>
    %63 = vector.extract %62[0, 0, 0, 0] : f32 from vector<1x1x1x1xf32>
    %cst_24 = arith.constant 8.000000e+00 : f32
    %64 = arith.divf %63, %cst_24 : f32
    %c0_25 = arith.constant 0 : index
    %65 = memref.load %arg4[%c0_25] : memref<5xf32, #tpu.memory_space<smem>>
    memref.store %64, %arg4[%c0_25] : memref<5xf32, #tpu.memory_space<smem>>
    %66 = vector.extract_strided_slice %14 {offsets = [0, 0, 0], sizes = [2, 4, 4], strides = [1, 1, 1]} : vector<2x4x11xf32> to vector<2x4x4xf32>
    %67 = vector.extract_strided_slice %15 {offsets = [0, 0, 0], sizes = [2, 4, 4], strides = [1, 1, 1]} : vector<2x4x11xf32> to vector<2x4x4xf32>
    %cst_26 = arith.constant 0.000000e+00 : f32
    %68 = vector.broadcast %cst_26 : f32 to vector<2x4x4xf32>
    %69 = arith.maximumf %66, %68 : vector<2x4x4xf32>
    %70 = arith.mulf %66, %67 : vector<2x4x4xf32>
    %71 = arith.subf %69, %70 : vector<2x4x4xf32>
    %72 = math.absf %66 : vector<2x4x4xf32>
    %cst_27 = arith.constant 0.000000e+00 : f32
    %73 = vector.broadcast %cst_27 : f32 to vector<2x4x4xf32>
    %74 = arith.subf %73, %72 : vector<2x4x4xf32>
    %75 = math.exp %74 : vector<2x4x4xf32>
    %76 = math.log1p %75 : vector<2x4x4xf32>
    %77 = arith.addf %71, %76 : vector<2x4x4xf32>
    %78 = arith.mulf %66, %67 : vector<2x4x4xf32>
    %cst_28 = arith.constant 1.000000e+00 : f32
    %79 = vector.broadcast %cst_28 : f32 to vector<2x4x4xf32>
    %80 = arith.subf %79, %66 : vector<2x4x4xf32>
    %cst_29 = arith.constant 1.000000e+00 : f32
    %81 = vector.broadcast %cst_29 : f32 to vector<2x4x4xf32>
    %82 = arith.subf %81, %67 : vector<2x4x4xf32>
    %83 = arith.mulf %80, %82 : vector<2x4x4xf32>
    %84 = arith.addf %78, %83 : vector<2x4x4xf32>
    %cst_30 = arith.constant 1.000000e+00 : f32
    %85 = vector.broadcast %cst_30 : f32 to vector<2x4x4xf32>
    %86 = arith.subf %85, %84 : vector<2x4x4xf32>
    %cst_31 = arith.constant 7.500000e-01 : f32
    %87 = vector.broadcast %cst_31 : f32 to vector<2x4x4xf32>
    %88 = arith.mulf %87, %67 : vector<2x4x4xf32>
    %cst_32 = arith.constant 1.000000e+00 : f32
    %89 = vector.broadcast %cst_32 : f32 to vector<2x4x4xf32>
    %90 = arith.subf %89, %67 : vector<2x4x4xf32>
    %cst_33 = arith.constant 2.500000e-01 : f32
    %91 = vector.broadcast %cst_33 : f32 to vector<2x4x4xf32>
    %92 = arith.mulf %91, %90 : vector<2x4x4xf32>
    %93 = arith.addf %88, %92 : vector<2x4x4xf32>
    %94 = arith.mulf %93, %77 : vector<2x4x4xf32>
    %95 = arith.mulf %86, %86 : vector<2x4x4xf32>
    %96 = arith.mulf %94, %95 : vector<2x4x4xf32>
    %97 = vector.shape_cast %96 : vector<2x4x4xf32> to vector<1x2x4x4xf32>
    %cst_34 = arith.constant dense<0.000000e+00> : vector<1xf32>
    %98 = vector.multi_reduction <add>, %97, %cst_34 [1, 2, 3] : vector<1x2x4x4xf32> to vector<1xf32>
    %99 = vector.shape_cast %98 : vector<1xf32> to vector<1x1x1x1xf32>
    %100 = vector.extract %99[0, 0, 0, 0] : f32 from vector<1x1x1x1xf32>
    %cst_35 = arith.constant 4.000000e+00 : f32
    %cst_36 = arith.constant 8.000000e+00 : f32
    %101 = arith.mulf %cst_35, %cst_36 : f32
    %cst_37 = arith.constant 8.000000e+00 : f32
    %102 = arith.divf %cst_37, %101 : f32
    %103 = arith.mulf %100, %102 : f32
    %c1 = arith.constant 1 : index
    %104 = memref.load %arg4[%c1] : memref<5xf32, #tpu.memory_space<smem>>
    memref.store %103, %arg4[%c1] : memref<5xf32, #tpu.memory_space<smem>>
    %105 = vector.extract_strided_slice %14 {offsets = [0, 0, 4], sizes = [2, 4, 7], strides = [1, 1, 1]} : vector<2x4x11xf32> to vector<2x4x7xf32>
    %106 = vector.extract_strided_slice %15 {offsets = [0, 0, 4], sizes = [2, 4, 7], strides = [1, 1, 1]} : vector<2x4x11xf32> to vector<2x4x7xf32>
    %107 = arith.subf %105, %106 : vector<2x4x7xf32>
    %108 = math.absf %107 : vector<2x4x7xf32>
    %109 = vector.extract_strided_slice %108 {offsets = [0, 0, 0], sizes = [2, 4, 3], strides = [1, 1, 1]} : vector<2x4x7xf32> to vector<2x4x3xf32>
    %110 = vector.shape_cast %109 : vector<2x4x3xf32> to vector<1x2x4x3xf32>
    %cst_38 = arith.constant dense<0.000000e+00> : vector<1xf32>
    %111 = vector.multi_reduction <add>, %110, %cst_38 [1, 2, 3] : vector<1x2x4x3xf32> to vector<1xf32>
    %112 = vector.shape_cast %111 : vector<1xf32> to vector<1x1x1x1xf32>
    %113 = vector.extract %112[0, 0, 0, 0] : f32 from vector<1x1x1x1xf32>
    %cst_39 = arith.constant 2.400000e+01 : f32
    %114 = arith.divf %113, %cst_39 : f32
    %c2 = arith.constant 2 : index
    %115 = memref.load %arg4[%c2] : memref<5xf32, #tpu.memory_space<smem>>
    memref.store %114, %arg4[%c2] : memref<5xf32, #tpu.memory_space<smem>>
    %116 = vector.extract_strided_slice %108 {offsets = [0, 0, 3], sizes = [2, 4, 3], strides = [1, 1, 1]} : vector<2x4x7xf32> to vector<2x4x3xf32>
    %117 = vector.shape_cast %116 : vector<2x4x3xf32> to vector<1x2x4x3xf32>
    %cst_40 = arith.constant dense<0.000000e+00> : vector<1xf32>
    %118 = vector.multi_reduction <add>, %117, %cst_40 [1, 2, 3] : vector<1x2x4x3xf32> to vector<1xf32>
    %119 = vector.shape_cast %118 : vector<1xf32> to vector<1x1x1x1xf32>
    %120 = vector.extract %119[0, 0, 0, 0] : f32 from vector<1x1x1x1xf32>
    %cst_41 = arith.constant 2.400000e+01 : f32
    %121 = arith.divf %120, %cst_41 : f32
    %c3 = arith.constant 3 : index
    %122 = memref.load %arg4[%c3] : memref<5xf32, #tpu.memory_space<smem>>
    memref.store %121, %arg4[%c3] : memref<5xf32, #tpu.memory_space<smem>>
    %123 = vector.extract_strided_slice %108 {offsets = [0, 0, 6], sizes = [2, 4, 1], strides = [1, 1, 1]} : vector<2x4x7xf32> to vector<2x4x1xf32>
    %124 = vector.shape_cast %123 : vector<2x4x1xf32> to vector<1x2x4x1xf32>
    %cst_42 = arith.constant dense<0.000000e+00> : vector<1xf32>
    %125 = vector.multi_reduction <add>, %124, %cst_42 [1, 2, 3] : vector<1x2x4x1xf32> to vector<1xf32>
    %126 = vector.shape_cast %125 : vector<1xf32> to vector<1x1x1x1xf32>
    %127 = vector.extract %126[0, 0, 0, 0] : f32 from vector<1x1x1x1xf32>
    %cst_43 = arith.constant 8.000000e+00 : f32
    %128 = arith.divf %127, %cst_43 : f32
    %c4 = arith.constant 4 : index
    %129 = memref.load %arg4[%c4] : memref<5xf32, #tpu.memory_space<smem>>
    memref.store %128, %arg4[%c4] : memref<5xf32, #tpu.memory_space<smem>>
    return
  }
}

</mosaic_0001>

<bundles_post_ra>
// kernel: tpu_custom_call.1
= control target key start
LH: loop header
LB: loop body
LE: loop exit
PB: predicated region body
PF: predicated region fallthrough
CT: control target
= control target key end

     0   :  { %v935_v2 = vmov 0   ;;  %v936_v7 = vmov 0.0   ;;  %vm937_vm0 = vmmov 0   ;;  %s1075_s0 = inlined_call_operand.vmem [shape: s32[2,4,1], index: 0, kind: input, shape index: {}]   ;;  %s1076_s1 = inlined_call_operand.vmem [shape: s32[2,4,1], index: 1, kind: input, shape index: {}]   ;;  %s1077_s2 = inlined_call_operand.vmem [shape: f32[2,8,11], index: 2, kind: input, shape index: {}]   ;;  %s1078_s3 = inlined_call_operand.vmem [shape: f32[2,4,11], index: 3, kind: input, shape index: {}]   ;;  %s1079_s4 = inlined_call_operand.hbm [shape: f32[5], index: 4, kind: output, shape index: {}]  }
   0x1   :  { %v24_v0 = vld [vmem:[%s1075_s0] sm:$0xf]  ;;  %900 = vset.pattern.permute.xlu0 %v935_v2  ;;  %901 = vset.pattern.permute.xlu1 %v935_v2  ;;  %v981_v4 = vld [vmem:[%s1077_s2 + $0x8] sm:$0xff]  ;;  %v25_v5 = vld [vmem:[%s1075_s0 + $0x4] sm:$0xf] }
   0x2   :  { %v38_v1 = vld [vmem:[%s1076_s1] sm:$0xf]  ;;  %27 = vperm.xlu0 %900, %v24_v0   ;;  %v39_v6 = vld [vmem:[%s1076_s1 + $0x4] sm:$0xf]  ;;  %853 = vmatprep.subr.mxu0 %v936_v7 }
   0x3   :  { %v976_v3 = vld [vmem:[%s1077_s2] sm:$0xff]  ;;  %41 = vperm.xlu1 %901, %v38_v1   ;;  %855 = vmatprep.mubr.msk.f32.mxu0 %vm937_vm0, %v936_v7 }
   0x4   :  { %9 = vsyncpa [#allocation3], 0  ;;  %854 = vmatpush3.msra.mxu0 %v976_v3  ;;  %858 = vmatprep.subr.mxu1 %v936_v7  ;;  %v22_v8 = vlaneseq  ;;  %vm353_vm1 = vcmask 60416   ;;  %vm52_vm2 = vcmask 64512   ;;  %v20_v12 = vld [vmem:[%s1078_s3] sm:$0xf] }
   0x5   :  { %863 = vmatprep.subr.mxu0 %v936_v7  ;;  %859 = vmatpush3.msra.mxu1 %v981_v4  ;;  %vm203_vm5 = vcmask 1043456   ;;  %vm199_vm6 = vcmask 31744   ;;  %v21_v19 = vld [vmem:[%s1078_s3 + $0x4] sm:$0xf]  ;;  %s938_s3 = smov 124   ;;  %s939_s28 = smov 121  }
   0x6   :  { %30 = vperm.xlu0 %900, %v25_v5   ;;  %860 = vmatprep.mubr.msk.f32.mxu1 %vm937_vm0, %v936_v7  ;;  %v999_v9 = vand.u32 127, %v22_v8  ;;  %s940_s29 = smov 118   ;;  %vm720_vm11 = vcmask 27648   ;;  %vm748_vm13 = vcmask 19456   ;;  %s941_s14 = smov [#allocation2]  }
   0x7   :  { %44 = vperm.xlu1 %901, %v39_v6   ;;  %868 = vmatprep.subr.mxu1 %v936_v7 }
   0x8   :  { %vm368_vm12 = vcmp.eq.s32.totalorder %v999_v9, 0 }
  0x7d   :  { %v28_v10 = vpop.permute.xlu0 %27 }
  0x7e   :  { %v42_v11 = vpop.permute.xlu1 %41  ;;  %vm32_vm3 = vcmp.eq.s32.totalorder %v999_v9, %v28_v10 }
  0x7f   :  { %vm46_vm4 = vcmp.eq.s32.totalorder %v999_v9, %v42_v11  ;;  %v826_v13 = vsel %vm32_vm3, 1.0, %v936_v7 }
  0x80   :  { %v354_v14 = vsel %vm353_vm1, %v826_v13, 0.0  ;;  %856 = vmatmul.mubr.msk.f32.vlgmr.msra.gmra.mxu0 %vm52_vm2, %v826_v13  ;;  %v828_v16 = vsel %vm46_vm4, 1.0, %v936_v7 }
  0x81   :  { %v355_v15 = vrot.slane %v354_v14, 4  ;;  %v31_v17 = vpop.permute.xlu0 %30  ;;  %864 = vmatpush3.msk.msra.mxu0 %vm203_vm5, %v20_v12  ;;  %865 = vmatprep.mubr.msk.f32.mxu0 %vm937_vm0, %v936_v7 }
  0x82   :  { %v45_v18 = vpop.permute.xlu1 %44  ;;  %vm33_vm7 = vcmp.eq.s32.totalorder %v999_v9, %v31_v17  ;;  %873 = vmatprep.subr.mxu0 %v936_v7 }
  0x83   :  { %vm47_vm8 = vcmp.eq.s32.totalorder %v999_v9, %v45_v18  ;;  %v356_v20 = vadd.f32 %v355_v15, %v354_v14  ;;  %v827_v21 = vsel %vm33_vm7, 1.0, %v936_v7 }
  0x84   :  { %v361_v22 = vsel %vm353_vm1, %v827_v21, 0.0  ;;  %v902_v23 = vpack.i.bf16 %v827_v21, %v826_v13  ;;  %861 = vmatmul.mubr.msk.f32.vlgmr.msra.gmra.mxu1 %vm52_vm2, %v827_v21  ;;  %866 = vmatmul.mubr.msk.f32.vlgmr.msra.gmra.mxu0 %vm199_vm6, %v828_v16  ;;  %v829_v25 = vsel %vm47_vm8, 1.0, %v936_v7 }
  0x85   :  { %v362_v24 = vrot.slane %v361_v22, 4  ;;  %869 = vmatpush3.msk.msra.mxu1 %vm203_vm5, %v21_v19  ;;  %870 = vmatprep.mubr.msk.f32.mxu1 %vm937_vm0, %v936_v7  ;;  %v357_v26 = vrot.slane %v356_v20, 2 }
  0x86   :  { %903 = vxpose.xlu0.b32.start.end [1/1] (short) (narrow) %v902_v23, 8  ;;  %878 = vmatprep.subr.mxu1 %v936_v7 }
  0x87   :  { %v363_v27 = vadd.f32 %v362_v24, %v361_v22  ;;  %v358_v28 = vadd.f32 %v357_v26, %v356_v20  ;;  %874 = vmatpush3.msk.msra.mxu0 %vm203_vm5, %v20_v12  ;;  %875 = vmatprep.mubr.msk.f32.mxu0 %vm937_vm0, %v936_v7 }
  0x88   :  { %871 = vmatmul.mubr.msk.f32.vlgmr.msra.gmra.mxu1 %vm199_vm6, %v829_v25 }
  0x89   :  { %v359_v29 = vrot.slane %v358_v28, 1  ;;  %v364_v30 = vrot.slane %v363_v27, 2  ;;  %879 = vmatpush3.msk.msra.mxu1 %vm203_vm5, %v21_v19  ;;  %880 = vmatprep.mubr.msk.f32.mxu1 %vm937_vm0, %v936_v7  ;;  %vm795_vm0 = vcmask 3072  }
  0x8b   :  { %v360_v31 = vadd.f32 %v359_v29, %v358_v28  ;;  %v365_v32 = vadd.f32 %v364_v30, %v363_v27 }
  0x8d   :  { %v371_v33 = vsub.f32 1.0, %v360_v31  ;;  %v366_v34 = vrot.slane %v365_v32, 1 }
  0x8f   :  { %374 = vbcast.lane.b32.xlu1 %v371_v33, 256  ;;  %v367_v35 = vadd.f32 %v366_v34, %v365_v32 }
  0x91   :  { %v372_v36 = vsub.f32 1.0, %v367_v35 }
  0x93   :  { %377 = vbcast.lane.b32.xlu1 %v372_v36, 256 }
 0x102   :  { %v904_v37 = vpop.trf.xlu0 }
 0x103   :  { %v908_v38 = vunpack.i.h.bf16 %v904_v37  ;;  %v905_v39 = vunpack.i.l.bf16 %v904_v37 }
 0x105   :  { %876 = vmatmul.mubr.msk.f32.vlgmr.msra.gmra.mxu0 %vm199_vm6, %v905_v39  ;;  %881 = vmatmul.mubr.msk.f32.vlgmr.msra.gmra.mxu1 %vm199_vm6, %v908_v38 }
 0x140   :  { %v1037_v40 = vpop.f32.mrf.mxu0 }
 0x141   :  { %v670_v41 = vand.u32 2147483647, %v1037_v40  ;;  %v698_v13 = vsub.f32 1.0, %v1037_v40  ;;  %v664_v22 = vmax.f32 %v1037_v40, 0.0 }
 0x142   :  { %v857_v42 = vpop.f32.mrf.mxu0 }
 0x143   :  { %v672_v43 = vsub.f32 0.0, %v670_v41 }
 0x144   :  { %v195_v44 = vpop.f32.mrf.mxu1  ;;  %v273_v45 = vpop.f32.mrf.mxu0 }
 0x145   :  { %v674_v46 = vmul.f32 1.442695, %v672_v43  ;;  %v671_v47 = vand.u32 2147483647, %v195_v44  ;;  %v736_v49 = vsub.f32 %v1037_v40, %v273_v45  ;;  %v699_v6 = vsub.f32 1.0, %v195_v44 }
 0x146   :  { %v862_v48 = vpop.f32.mrf.mxu1  ;;  %v867_v50 = vpop.f32.mrf.mxu0  ;;  %v700_v8 = vsub.f32 1.0, %v273_v45  ;;  %v665_v19 = vmax.f32 %v195_v44, 0.0  ;;  %v666_v20 = vmul.f32 %v273_v45, %v1037_v40  ;;  %v708_v29 = vmul.f32 0.75, %v273_v45 }
 0x147   :  { %v673_v51 = vsub.f32 0.0, %v671_v47  ;;  %909 = vpow2.f32 %v674_v46  ;;  %v738_v53 = vand.u32 2147483647, %v736_v49  ;;  %v597_v49 = vand.u32 2147483647, %v976_v3 }
 0x148   :  { %v349_v52 = vpop.f32.mrf.mxu1  ;;  %v702_v21 = vmul.f32 %v700_v8, %v698_v13  ;;  %v668_v31 = vsub.f32 %v664_v22, %v666_v20  ;;  %v710_v32 = vmul.f32 0.25, %v700_v8  ;;  %v598_v50 = vand.u32 2147483647, %v981_v4 }
 0x149   :  { %v676_v54 = vmul.f32 1.442695, %v673_v51  ;;  %742 = vrot.lane.b32.xlu1 %v738_v53, %s938_s3  ;;  %v737_v56 = vsub.f32 %v195_v44, %v349_v52  ;;  %v701_v0 = vsub.f32 1.0, %v349_v52  ;;  %v667_v14 = vmul.f32 %v349_v52, %v195_v44 }
 0x14a   :  { %v872_v55 = vpop.f32.mrf.mxu1  ;;  %v709_v23 = vmul.f32 0.75, %v349_v52  ;;  %v704_v34 = vadd.f32 %v702_v21, %v666_v20  ;;  %v712_v38 = vadd.f32 %v710_v32, %v708_v29  ;;  %v599_v51 = vsub.f32 0.0, %v597_v49 }
 0x14b   :  { %911 = vpow2.f32 %v676_v54  ;;  %v739_v57 = vand.u32 2147483647, %v737_v56  ;;  %v703_v15 = vmul.f32 %v701_v0, %v699_v6  ;;  %v669_v26 = vsub.f32 %v665_v19, %v667_v14 }
 0x14c   :  { %v711_v27 = vmul.f32 0.25, %v701_v0  ;;  %v706_v39 = vsub.f32 1.0, %v704_v34  ;;  %v600_v52 = vsub.f32 0.0, %v598_v50  ;;  %v591_v22 = vmax.f32 %v976_v3, 0.0 }
 0x14d   :  { %744 = vrot.lane.b32.xlu1 %v739_v57, %s938_s3  ;;  %v705_v28 = vadd.f32 %v703_v15, %v667_v14  ;;  %v626_v29 = vsub.f32 1.0, %v981_v4 }
 0x14e   :  { %v713_v35 = vadd.f32 %v711_v27, %v709_v23  ;;  %v716_v43 = vmul.f32 %v706_v39, %v706_v39  ;;  %v603_v54 = vmul.f32 1.442695, %v600_v52 }
 0x14f   :  { %v707_v37 = vsub.f32 1.0, %v705_v28  ;;  %v592_v28 = vmax.f32 %v981_v4, 0.0 }
 0x151   :  { %766 = vrot.lane.b32.xlu1 %v738_v53, %s939_s28  ;;  %v717_v42 = vmul.f32 %v707_v37, %v707_v37 }
 0x154   :  { %v910_v58 = vpop.eup %909 }
 0x155   :  { %768 = vrot.lane.b32.xlu1 %v739_v57, %s939_s28  ;;  %v678_v60 = vadd.f32 1.0, %v910_v58  ;;  %v681_v63 = vmul.f32 -0.5, %v910_v58  ;;  %v684_v16 = vand.u32 2147483647, %v910_v58 }
 0x157   :  { %v682_v11 = vadd.f32 1.0, %v681_v63  ;;  %vm685_vm10 = vcmp.lt.f32.partialorder %v684_v16, 0.0004427343 }
 0x158   :  { %v912_v59 = vpop.eup %911 }
 0x159   :  { %v687_v61 = vadd.f32 1.0, %v912_v59  ;;  %789 = vrot.lane.b32.xlu1 %v738_v53, %s940_s29  ;;  %v690_v62 = vmul.f32 -0.5, %v912_v59  ;;  %v693_v10 = vand.u32 2147483647, %v912_v59  ;;  %v683_v24 = vmul.f32 %v910_v58, %v682_v11 }
 0x15a   :  { %v601_v53 = vmul.f32 1.442695, %v599_v51 }
 0x15b   :  { %913 = vlog2.f32 %v687_v61  ;;  %v691_v2 = vadd.f32 1.0, %v690_v62  ;;  %vm694_vm9 = vcmp.lt.f32.partialorder %v693_v10, 0.0004427343 }
 0x15c   :  { %915 = vlog2.f32 %v678_v60 }
 0x15d   :  { %791 = vrot.lane.b32.xlu1 %v739_v57, %s940_s29  ;;  %v692_v18 = vmul.f32 %v912_v59, %v691_v2  ;;  %917 = vpow2.f32 %v601_v53  ;;  %v375_v59 = vpop.permute.xlu1 %374  ;;  %v836_v2 = vsel %vm368_vm12, 1.0, %v936_v7 }
 0x15e   :  { %919 = vpow2.f32 %v603_v54  ;;  %v379_v15 = vmul.f32 %v836_v2, %v375_v59 }
 0x161   :  { %v378_v60 = vpop.permute.xlu1 %377 }
 0x168   :  { %v914_v1 = vpop.eup %913 }
 0x169   :  { %v916_v5 = vpop.eup %915  ;;  %v689_v12 = vmul.f32 0.6931472, %v914_v1 }
 0x16a   :  { %v680_v17 = vmul.f32 0.6931472, %v916_v5  ;;  %v918_v55 = vpop.eup %917 }
 0x16b   :  { %v695_v25 = vsel %vm694_vm9, %v692_v18, %v689_v12  ;;  %v920_v56 = vpop.eup %919  ;;  %v605_v57 = vadd.f32 1.0, %v918_v55  ;;  %v608_v61 = vmul.f32 -0.5, %v918_v55  ;;  %v611_v6 = vand.u32 2147483647, %v918_v55 }
 0x16c   :  { %v686_v30 = vsel %vm685_vm10, %v683_v24, %v680_v17  ;;  %v697_v33 = vadd.f32 %v695_v25, %v669_v26  ;;  %v614_v58 = vadd.f32 1.0, %v920_v56  ;;  %v617_v63 = vmul.f32 -0.5, %v920_v56 }
 0x16d   :  { %v696_v36 = vadd.f32 %v686_v30, %v668_v31  ;;  %921 = vlog2.f32 %v605_v57  ;;  %v609_v0 = vadd.f32 1.0, %v608_v61  ;;  %v620_v13 = vand.u32 2147483647, %v920_v56 }
 0x16e   :  { %v715_v41 = vmul.f32 %v713_v35, %v697_v33  ;;  %923 = vlog2.f32 %v614_v58  ;;  %v618_v8 = vadd.f32 1.0, %v617_v63  ;;  %v380_v18 = vmul.f32 %v836_v2, %v378_v60 }
 0x16f   :  { %v714_v40 = vmul.f32 %v712_v38, %v696_v36  ;;  %v610_v17 = vmul.f32 %v918_v55, %v609_v0  ;;  %vm1050_vm14 = vcmp.lt.f32.partialorder %v611_v6, 0.0004427343  ;;  %vm1055_vm15 = vcmp.lt.f32.partialorder %v620_v13, 0.0004427343 }
 0x170   :  { %v719_v44 = vmul.f32 %v717_v42, %v715_v41  ;;  %v619_v20 = vmul.f32 %v920_v56, %v618_v8  ;;  %v625_v26 = vsub.f32 1.0, %v976_v3 }
 0x171   :  { %v718_v46 = vmul.f32 %v716_v43, %v714_v40 }
 0x172   :  { %v722_v47 = vsel %vm720_vm11, %v719_v44, 0.0 }
 0x173   :  { %v721_v48 = vsel %vm720_vm11, %v718_v46, 0.0 }
 0x174   :  { %v723_v45 = vadd.f32 %v722_v47, %v721_v48 }
 0x17a   :  { %v922_v1 = vpop.eup %921 }
 0x17b   :  { %v924_v10 = vpop.eup %923  ;;  %v607_v16 = vmul.f32 0.6931472, %v922_v1 }
 0x17c   :  { %v616_v7 = vmul.f32 0.6931472, %v924_v10 }
 0x17d   :  { %v613_v32 = vsel %vm1050_vm14, %v610_v17, %v607_v16 }
 0x17e   :  { %v622_v37 = vsel %vm1055_vm15, %v619_v20, %v616_v7 }
 0x181   :  { %724 = vadd.xlane.f32.xlu1 %v723_v45 }
 0x1bb   :  { %v743_v62 = vpop.permute.xlu1 %742 }
 0x1bc   :  { %v749_v11 = vsel %vm748_vm13, %v743_v62, 0.0 }
 0x1bf   :  { %v745_v5 = vpop.permute.xlu1 %744 }
 0x1c0   :  { %v750_v12 = vsel %vm748_vm13, %v745_v5, 0.0 }
 0x1c1   :  { %v751_v14 = vadd.f32 %v750_v12, %v749_v11 }
 0x1c3   :  { %v767_v9 = vpop.permute.xlu1 %766  ;;  %752 = vadd.xlane.f32.xlu1 %v751_v14 }
 0x1c4   :  { %v772_v38 = vsel %vm748_vm13, %v767_v9, 0.0 }
 0x1c5   :  { %v482_v21 = vpop.f32.mrf.mxu0  ;;  %v587_v23 = vpop.f32.mrf.mxu1 }
 0x1c6   :  { %v483_v25 = vadd.f32 %v482_v21, %v379_v15  ;;  %v588_v27 = vadd.f32 %v587_v23, %v380_v18 }
 0x1c7   :  { %v882_v30 = vpop.f32.mrf.mxu1  ;;  %v877_v31 = vpop.f32.mrf.mxu0 }
 0x1c8   :  { %v593_v33 = vmul.f32 %v483_v25, %v976_v3  ;;  %v627_v34 = vsub.f32 1.0, %v483_v25  ;;  %v594_v35 = vmul.f32 %v588_v27, %v981_v4  ;;  %v769_v36 = vpop.permute.xlu1 %768  ;;  %v635_v39 = vmul.f32 0.75, %v483_v25 }
 0x1c9   :  { %v628_v41 = vsub.f32 1.0, %v588_v27  ;;  %v773_v40 = vsel %vm748_vm13, %v769_v36, 0.0  ;;  %v636_v48 = vmul.f32 0.75, %v588_v27 }
 0x1ca   :  { %v595_v42 = vsub.f32 %v591_v22, %v593_v33  ;;  %v629_v43 = vmul.f32 %v627_v34, %v625_v26  ;;  %v637_v44 = vmul.f32 0.25, %v627_v34  ;;  %v596_v46 = vsub.f32 %v592_v28, %v594_v35 }
 0x1cb   :  { %v630_v47 = vmul.f32 %v628_v41, %v626_v29  ;;  %v638_v3 = vmul.f32 0.25, %v628_v41  ;;  %v774_v45 = vadd.f32 %v773_v40, %v772_v38 }
 0x1cc   :  { %v631_v49 = vadd.f32 %v629_v43, %v593_v33  ;;  %v639_v4 = vadd.f32 %v637_v44, %v635_v39  ;;  %v623_v50 = vadd.f32 %v613_v32, %v595_v42  ;;  %v624_v53 = vadd.f32 %v622_v37, %v596_v46  ;;  %v790_v54 = vpop.permute.xlu1 %789 }
 0x1cd   :  { %v632_v51 = vadd.f32 %v630_v47, %v594_v35  ;;  %v640_v52 = vadd.f32 %v638_v3, %v636_v48  ;;  %775 = vadd.xlane.f32.xlu1 %v774_v45  ;;  %v796_v6 = vsel %vm795_vm0, %v790_v54, 0.0 }
 0x1ce   :  { %v633_v55 = vsub.f32 1.0, %v631_v49  ;;  %v641_v57 = vmul.f32 %v639_v4, %v623_v50 }
 0x1cf   :  { %v634_v56 = vsub.f32 1.0, %v632_v51  ;;  %v642_v59 = vmul.f32 %v640_v52, %v624_v53 }
 0x1d0   :  { %v643_v58 = vmul.f32 %v633_v55, %v633_v55  ;;  %v792_v63 = vpop.permute.xlu1 %791 }
 0x1d1   :  { %v644_v60 = vmul.f32 %v634_v56, %v634_v56  ;;  %v797_v5 = vsel %vm795_vm0, %v792_v63, 0.0 }
 0x1d2   :  { %v645_v61 = vmul.f32 %v643_v58, %v641_v57  ;;  %v798_v8 = vadd.f32 %v797_v5, %v796_v6 }
 0x1d3   :  { %v646_v62 = vmul.f32 %v644_v60, %v642_v59 }
 0x1d4   :  { %v647_v0 = vsel %vm199_vm6, %v645_v61, 0.0 }
 0x1d5   :  { %v648_v1 = vsel %vm199_vm6, %v646_v62, 0.0 }
 0x1d6   :  { %v649_v2 = vadd.f32 %v648_v1, %v647_v0 }
 0x1d8   :  { %650 = vadd.xlane.f32.xlu0 %v649_v2 }
 0x1dc   :  { %799 = vadd.xlane.f32.xlu0 %v798_v8 }
 0x20a   :  { %v725_v10 = vpop.xlane.xlu1 %724 }
 0x20b   :  { %v726_v13 = vrot.slane %v725_v10, 4 }
 0x20d   :  { %v727_v16 = vadd.f32 %v726_v13, %v725_v10 }
 0x20f   :  { %v728_v9 = vrot.slane %v727_v16, 2 }
 0x211   :  { %v729_v24 = vadd.f32 %v728_v9, %v727_v16 }
 0x213   :  { %v730_v31 = vrot.slane %v729_v24, 1 }
 0x215   :  { %v731_v38 = vadd.f32 %v730_v31, %v729_v24 }
 0x24c   :  { %v753_v11 = vpop.xlane.xlu1 %752 }
 0x24d   :  { %v754_v14 = vrot.slane %v753_v11, 4 }
 0x24f   :  { %v755_v17 = vadd.f32 %v754_v14, %v753_v11 }
 0x251   :  { %v756_v7 = vrot.slane %v755_v17, 2 }
 0x253   :  { %v757_v27 = vadd.f32 %v756_v7, %v755_v17 }
 0x255   :  { %v758_v34 = vrot.slane %v757_v27, 1 }
 0x256   :  { %v776_v12 = vpop.xlane.xlu1 %775 }
 0x257   :  { %v777_v15 = vrot.slane %v776_v12, 4  ;;  %v759_v39 = vadd.f32 %v758_v34, %v757_v27 }
 0x259   :  { %v778_v18 = vadd.f32 %v777_v15, %v776_v12 }
 0x25b   :  { %v779_v21 = vrot.slane %v778_v18, 2 }
 0x25d   :  { %v780_v28 = vadd.f32 %v779_v21, %v778_v18 }
 0x25f   :  { %v781_v35 = vrot.slane %v780_v28, 1 }
 0x261   :  { %v651_v19 = vpop.xlane.xlu0 %650  ;;  %v782_v40 = vadd.f32 %v781_v35, %v780_v28 }
 0x262   :  { %v652_v20 = vrot.slane %v651_v19, 4 }
 0x264   :  { %v653_v22 = vadd.f32 %v652_v20, %v651_v19 }
 0x265   :  { %v800_v23 = vpop.xlane.xlu0 %799 }
 0x266   :  { %v654_v25 = vrot.slane %v653_v22, 2  ;;  %v801_v26 = vrot.slane %v800_v23, 4 }
 0x268   :  { %v802_v29 = vadd.f32 %v801_v26, %v800_v23  ;;  %v655_v30 = vadd.f32 %v654_v25, %v653_v22 }
 0x26a   :  { %v803_v32 = vrot.slane %v802_v29, 2  ;;  %v656_v33 = vrot.slane %v655_v30, 1 }
 0x26c   :  { %v804_v36 = vadd.f32 %v803_v32, %v802_v29  ;;  %v657_v37 = vadd.f32 %v656_v33, %v655_v30 }
 0x26e   :  { %883 = vpush %v657_v37  ;;  %v805_v41 = vrot.slane %v804_v36, 1 }
 0x26f   :  { %885 = vpush %v731_v38 }
 0x270   :  { %887 = vpush %v759_v39  ;;  %v806_v42 = vadd.f32 %v805_v41, %v804_v36 }
 0x271   :  { %889 = vpush %v782_v40 }
 0x272   :  { %891 = vpush %v806_v42 }
 0x29f   :  { %s884_s30 = spop %883 }
 0x2a0   :  { %s661_s5 = smul.f32 0.125, %s884_s30  ;;  %s886_s6 = spop %885 }
 0x2a1   :  { %s733_s7 = smul.f32 0.25, %s886_s6  ;;  %s888_s8 = spop %887 }
 0x2a2   :  { %663 = sst [smem:[#allocation2]] %s661_s5  ;;  %s763_s9 = smul.f32 0.041666668, %s888_s8 }
 0x2a3   :  { %735 = sst [smem:[#allocation2 + $0x1]] %s733_s7  ;;  %s890_s10 = spop %889 }
 0x2a4   :  { %765 = sst [smem:[#allocation2 + $0x2]] %s763_s9  ;;  %s786_s11 = smul.f32 0.041666668, %s890_s10 }
 0x2a5   :  { %s892_s12 = spop %891 }
 0x2a6   :  { %788 = sst [smem:[#allocation2 + $0x3]] %s786_s11  ;;  %s810_s13 = smul.f32 0.125, %s892_s12 }
 0x2a8   :  { %812 = sst [smem:[#allocation2 + $0x4]] %s810_s13 }
 0x2a9   :  { %820 = dma.smem_to_hbm %s941_s14, 16, %s1079_s4, [#allocation3]  }
 0x2aa   :  { %933 = dma.done.wait [#allocation3], 16  }
 0x2ab   :  { %934 = vsyncadd [#allocation3], 4294967280 }
 0x2ac   :  { %824 = sfence }
 0x2ad   :  { %825 = vsyncpa [#allocation3], 1 }

</bundles_post_ra>
